<compile_context>
chip_gen: v6e
topology: v6e:2x2x1
jax: 0.10.0
libtpu: 0.0.40
codegen_flags: <defaults>
</compile_context>

<pallas_src>
import jax
import jax.numpy as jnp
from jax.experimental import pallas as pl
from jax.experimental.pallas import tpu as pltpu


# ---------------------------------------------------------------------------
# Parameter slab layout (17 rows x 512 lanes) -- packed ONCE at init, every
# weight block 128-lane aligned:
#   cols   0:8     W1 (16x8 in rows 0:16)
#   col    8       b1 (rows 0:16), row 16 = 1          -> "ones row" seed
#   cols 128:144   W2 (16x16),  col 144 = b2, row 16 @ col 144 = 1
#   cols 256:272   W3 (16x16),  col 272 = b3, row 16 @ col 272 = 1
#   cols 384:400   W4 ( 4x16 in rows 0:4), col 400 = b4
# The augmented constant-1 row survives ReLU (relu(1)=1), so all four biases
# ride inside the matmuls.
# ---------------------------------------------------------------------------
_P_ROWS = 17
_P_COLS = 512
_TB_MAX = 4096          # max batch tile (lanes) per grid step; multiple of 128
_LANE = 128


def _policy_kernel(p_ref, x_ref, o_ref):
    x = x_ref[...].astype(jnp.float32)   # (8, TB); bf16 inputs upcast on VPU
    p = p_ref[...]                        # (17, 512) f32 parameter slab

    w1 = p[:, 0:8]                        # (17, 8)
    b1 = p[:, 8:9]                        # (17, 1)  (row 16 == 1 -> ones row)
    w2 = p[:, 128:145]                    # (17, 17) [W2 | b2] augmented
    w3 = p[:, 256:273]                    # (17, 17) [W3 | b3] augmented
    w4 = p[0:4, 384:401]                  # (4, 17)  [W4 | b4]

    # Layer 1: Linear(8,16)+ReLU; bias folded, row 16 of h becomes const 1.
    h = jnp.dot(w1, x, preferred_element_type=jnp.float32) + b1        # (17, TB)
    h = jnp.maximum(h, 0.0)
    # Layers 2,3: Linear(16,16)+ReLU; biases folded via the augmented ones row.
    h = jnp.maximum(jnp.dot(w2, h, preferred_element_type=jnp.float32), 0.0)
    h = jnp.maximum(jnp.dot(w3, h, preferred_element_type=jnp.float32), 0.0)
    # Layer 4: Linear(16,4) -> logits (4, TB)
    logits = jnp.dot(w4, h, preferred_element_type=jnp.float32)

    # Softmax over the 4 action rows: pairwise VPU max/add, EUP exp,
    # exact EUP reciprocal (probabilities feed REINFORCE gradients).
    r0, r1 = logits[0:1, :], logits[1:2, :]
    r2, r3 = logits[2:3, :], logits[3:4, :]
    m = jnp.maximum(jnp.maximum(r0, r1), jnp.maximum(r2, r3))          # (1, TB)
    e = jnp.exp(logits - m)                                            # (4, TB)
    s = (e[0:1, :] + e[1:2, :]) + (e[2:3, :] + e[3:4, :])              # (1, TB)
    o_ref[...] = e * pl.reciprocal(s)


def pack_params(params):
    """One-time packing of torch-layout params (w_i: (out,in), b_i: (out,))
    into the lane-aligned (17, 512) kernel slab. Call at init, NOT per step."""
    slab = jnp.zeros((_P_ROWS, _P_COLS), jnp.float32)
    slab = slab.at[0:16, 0:8].set(params["w1"])
    slab = slab.at[0:16, 8].set(params["b1"])
    slab = slab.at[16, 8].set(1.0)
    slab = slab.at[0:16, 128:144].set(params["w2"])
    slab = slab.at[0:16, 144].set(params["b2"])
    slab = slab.at[16, 144].set(1.0)
    slab = slab.at[0:16, 256:272].set(params["w3"])
    slab = slab.at[0:16, 272].set(params["b3"])
    slab = slab.at[16, 272].set(1.0)
    slab = slab.at[0:4, 384:400].set(params["w4"])
    slab = slab.at[0:4, 400].set(params["b4"])
    return slab


def _round_up(n, m):
    return ((n + m - 1) // m) * m


_NUM_TC_CACHE = None


def _num_tensorcores():
    """2 for megacore chips (v7x / v4-class), else 1.  Python-level, cached."""
    global _NUM_TC_CACHE
    if _NUM_TC_CACHE is None:
        try:
            kind = jax.devices()[0].device_kind.lower()
            _NUM_TC_CACHE = 2 if ("7" in kind or "v4" in kind) else 1
        except Exception:  # pragma: no cover - non-TPU fallbacks
            _NUM_TC_CACHE = 1
    return _NUM_TC_CACHE


def _choose_tiling(B):
    """Padded batch (lanes), tile width, and grid steps for a batch of B."""
    n_tc = _num_tensorcores()
    # Bucket to 128-lane multiples: unmasked vld/vst and shared Mosaic
    # compiles across nearby rollout lengths.
    bp = _round_up(max(B, 1), _LANE)
    if bp <= _TB_MAX * n_tc:
        # Few enough lanes: minimize grid steps (single block on 1-TC chips);
        # on megacore chips give each TensorCore one "parallel" tile.
        n_tiles = n_tc if (n_tc > 1 and bp >= 2 * _LANE) else 1
    else:
        n_tiles = -(-bp // _TB_MAX)                      # cdiv
        if n_tc > 1 and n_tiles % n_tc:                  # keep both TCs busy
            n_tiles += n_tc - (n_tiles % n_tc)
    tb = _round_up(-(-bp // n_tiles), _LANE)
    bp = tb * n_tiles
    return bp, tb, n_tiles


def my_policy_forward(x, packed_params, *, x_dtype=jnp.float32,
                      lane_major_output=False):
    """x: (B, 8) (or (8,)) observations. packed_params: (17,512) slab from
    pack_params().  Returns softmax action probabilities, shape (B, 4)
    (or (4, B) with lane_major_output=True, skipping the output transpose)."""
    x = jnp.asarray(x, jnp.float32)            # torch.FloatTensor(x)
    squeeze = x.ndim == 1
    if squeeze:
        x = x[None, :]
    B = x.shape[0]
    bp, tb, n_tiles = _choose_tiling(B)

    xt = x.T                                   # (8, B): batch on the lane axis
    if x_dtype != jnp.float32:
        xt = xt.astype(x_dtype)                # e.g. bf16: halves input HBM bytes
    if bp != B:
        xt = jnp.pad(xt, ((0, 0), (0, bp - B)))

    out_t = pl.pallas_call(
        _policy_kernel,
        out_shape=jax.ShapeDtypeStruct((4, bp), jnp.float32),
        grid=(n_tiles,),
        in_specs=[
            # Parameter slab: constant index_map -> single DMA, VMEM-resident
            # across all batch tiles.
            pl.BlockSpec((_P_ROWS, _P_COLS), lambda i: (0, 0)),
            # Observations tiled over the batch (lane) axis.
            pl.BlockSpec((8, tb), lambda i: (0, i)),
        ],
        out_specs=pl.BlockSpec((4, tb), lambda i: (0, i)),
        compiler_params=pltpu.CompilerParams(
            dimension_semantics=("parallel",)),  # shards tiles across TCs on v7x
    )(packed_params, xt)

    out_t = out_t[:, :B]                       # drop padded lanes
    if lane_major_output:
        return out_t[:, 0] if squeeze else out_t
    out = out_t.T                              # back to (B, 4)
    return out[0] if squeeze else out


def init_params(key):
    """Deterministic init mimicking torch.nn.Linear default U(-1/sqrt(fan_in), .)."""
    dims = [(8, 16), (16, 16), (16, 16), (16, 4)]
    params = {}
    for i, (fan_in, fan_out) in enumerate(dims, start=1):
        key, kw, kb = jax.random.split(key, 3)
        bound = 1.0 / jnp.sqrt(fan_in)
        params[f"w{i}"] = jax.random.uniform(
            kw, (fan_out, fan_in), jnp.float32, minval=-bound, maxval=bound)
        params[f"b{i}"] = jax.random.uniform(
            kb, (fan_out,), jnp.float32, minval=-bound, maxval=bound)
    return params


def reference_forward(x, params):
    """Pure-JAX reference matching the PyTorch module (correctness check)."""
    h = jnp.maximum(x @ params["w1"].T + params["b1"], 0.0)
    h = jnp.maximum(h @ params["w2"].T + params["b2"], 0.0)
    h = jnp.maximum(h @ params["w3"].T + params["b3"], 0.0)
    logits = h @ params["w4"].T + params["b4"]
    return jax.nn.softmax(logits, axis=-1)


if __name__ == "__main__":
    key = jax.random.PRNGKey(0)
    key_p, key_x1, key_x2 = jax.random.split(key, 3)

    params = init_params(key_p)
    packed = pack_params(params)               # param glue hoisted out of the step loop

    fwd = jax.jit(my_policy_forward,
                  static_argnames=("x_dtype", "lane_major_output"))

    # Small batch (typical per-env-step policy call), 8-dim LunarLander states.
    # Wrapper buckets/pads it to one full 128-lane block (unmasked stores).
    x_small = jax.random.normal(key_x1, (8, 8), dtype=jnp.float32)
    p_small = jax.block_until_ready(fwd(x_small, packed))

    # Larger rollout batch: single block on v5e/v6e, 2 parallel tiles on v7x.
    x_big = jax.random.normal(key_x2, (1000, 8), dtype=jnp.float32)
    p_big = jax.block_until_ready(fwd(x_big, packed))

    # bf16 input-transfer path for large rollouts (compute stays f32).
    p_big_bf16 = jax.block_until_ready(fwd(x_big, packed, x_dtype=jnp.bfloat16))

    # Lane-major output path (skips the wrapper-side transpose).
    p_big_lane = jax.block_until_ready(
        fwd(x_big, packed, lane_major_output=True))

    ref_small = reference_forward(x_small, params)
    ref_big = reference_forward(x_big, params)

    assert p_small.shape == (8, 4)
    assert p_big.shape == (1000, 4)
    assert p_big_lane.shape == (4, 1000)
    # Rows of a softmax sum to 1 (exact reciprocal now -> tight tolerance).
    assert bool(jnp.all(jnp.abs(jnp.sum(p_small, axis=-1) - 1.0) < 1e-4))
    assert bool(jnp.all(jnp.abs(jnp.sum(p_big, axis=-1) - 1.0) < 1e-4))
    # Match the pure-JAX reference of the PyTorch module.
    assert bool(jnp.all(jnp.abs(p_small - ref_small) < 1e-4))
    assert bool(jnp.all(jnp.abs(p_big - ref_big) < 1e-4))
    assert bool(jnp.all(jnp.abs(p_big_lane.T - ref_big) < 1e-4))
    # bf16 path: only the input is rounded (f32 accumulation) -> loose tol.
    assert bool(jnp.all(jnp.abs(p_big_bf16 - ref_big) < 3e-2))

    print("KERNEL_OK")
</pallas_src>

<mosaic_0001>
module attributes {stable_mosaic.version = 11 : i64} {
  func.func @_policy_kernel(%arg0: i32, %arg1: memref<17x512xf32, #tpu.memory_space<vmem>>, %arg2: memref<8x128xf32, #tpu.memory_space<vmem>>, %arg3: memref<4x128xf32, #tpu.memory_space<vmem>>) attributes {dimension_semantics = [#tpu.dimension_semantics<parallel>], iteration_bounds = array<i64: 1>, scalar_prefetch = 0 : i64, scratch_operands = 0 : i64, tpu.core_type = #tpu.core_type<tc>, window_params = [{pipeline_mode = #tpu.pipeline_mode<synchronous>, transform_indices = @transform_0, window_bounds = array<i64: 17, 512>}, {transform_indices = @transform_1, window_bounds = array<i64: 8, 128>}, {transform_indices = @transform_2, window_bounds = array<i64: 4, 128>}]} {
    %c0 = arith.constant 0 : index
    %c0_0 = arith.constant 0 : index
    %0 = vector.load %arg2[%c0, %c0_0] : memref<8x128xf32, #tpu.memory_space<vmem>>, vector<8x128xf32>
    %c0_1 = arith.constant 0 : index
    %c0_2 = arith.constant 0 : index
    %1 = vector.load %arg1[%c0_1, %c0_2] : memref<17x512xf32, #tpu.memory_space<vmem>>, vector<17x512xf32>
    %2 = vector.extract_strided_slice %1 {offsets = [0, 0], sizes = [17, 8], strides = [1, 1]} : vector<17x512xf32> to vector<17x8xf32>
    %3 = vector.extract_strided_slice %1 {offsets = [0, 8], sizes = [17, 1], strides = [1, 1]} : vector<17x512xf32> to vector<17x1xf32>
    %4 = vector.extract_strided_slice %1 {offsets = [0, 128], sizes = [17, 17], strides = [1, 1]} : vector<17x512xf32> to vector<17x17xf32>
    %5 = vector.extract_strided_slice %1 {offsets = [0, 256], sizes = [17, 17], strides = [1, 1]} : vector<17x512xf32> to vector<17x17xf32>
    %6 = vector.extract_strided_slice %1 {offsets = [0, 384], sizes = [4, 17], strides = [1, 1]} : vector<17x512xf32> to vector<4x17xf32>
    %cst = arith.constant dense<0.000000e+00> : vector<17x128xf32>
    %7 = tpu.matmul %2, %0, %cst {dimension_numbers = #tpu.dot_dimension_numbers<[1], [0], [0], [1], [0, 0, 1, 1], [], []>} : vector<17x8xf32>, vector<8x128xf32>, vector<17x128xf32> -> vector<17x128xf32>
    %8 = vector.broadcast %3 : vector<17x1xf32> to vector<17x128xf32>
    %9 = arith.addf %7, %8 : vector<17x128xf32>
    %cst_3 = arith.constant 0.000000e+00 : f32
    %10 = vector.broadcast %cst_3 : f32 to vector<17x128xf32>
    %11 = arith.maximumf %9, %10 : vector<17x128xf32>
    %cst_4 = arith.constant dense<0.000000e+00> : vector<17x128xf32>
    %12 = tpu.matmul %4, %11, %cst_4 {dimension_numbers = #tpu.dot_dimension_numbers<[1], [0], [0], [1], [0, 0, 1, 1], [], []>} : vector<17x17xf32>, vector<17x128xf32>, vector<17x128xf32> -> vector<17x128xf32>
    %cst_5 = arith.constant 0.000000e+00 : f32
    %13 = vector.broadcast %cst_5 : f32 to vector<17x128xf32>
    %14 = arith.maximumf %12, %13 : vector<17x128xf32>
    %cst_6 = arith.constant dense<0.000000e+00> : vector<17x128xf32>
    %15 = tpu.matmul %5, %14, %cst_6 {dimension_numbers = #tpu.dot_dimension_numbers<[1], [0], [0], [1], [0, 0, 1, 1], [], []>} : vector<17x17xf32>, vector<17x128xf32>, vector<17x128xf32> -> vector<17x128xf32>
    %cst_7 = arith.constant 0.000000e+00 : f32
    %16 = vector.broadcast %cst_7 : f32 to vector<17x128xf32>
    %17 = arith.maximumf %15, %16 : vector<17x128xf32>
    %cst_8 = arith.constant dense<0.000000e+00> : vector<4x128xf32>
    %18 = tpu.matmul %6, %17, %cst_8 {dimension_numbers = #tpu.dot_dimension_numbers<[1], [0], [0], [1], [0, 0, 1, 1], [], []>} : vector<4x17xf32>, vector<17x128xf32>, vector<4x128xf32> -> vector<4x128xf32>
    %19 = vector.extract_strided_slice %18 {offsets = [0, 0], sizes = [1, 128], strides = [1, 1]} : vector<4x128xf32> to vector<1x128xf32>
    %20 = vector.extract_strided_slice %18 {offsets = [1, 0], sizes = [1, 128], strides = [1, 1]} : vector<4x128xf32> to vector<1x128xf32>
    %21 = vector.extract_strided_slice %18 {offsets = [2, 0], sizes = [1, 128], strides = [1, 1]} : vector<4x128xf32> to vector<1x128xf32>
    %22 = vector.extract_strided_slice %18 {offsets = [3, 0], sizes = [1, 128], strides = [1, 1]} : vector<4x128xf32> to vector<1x128xf32>
    %23 = arith.maximumf %19, %20 : vector<1x128xf32>
    %24 = arith.maximumf %21, %22 : vector<1x128xf32>
    %25 = arith.maximumf %23, %24 : vector<1x128xf32>
    %26 = vector.broadcast %25 : vector<1x128xf32> to vector<4x128xf32>
    %27 = arith.subf %18, %26 : vector<4x128xf32>
    %28 = math.exp %27 : vector<4x128xf32>
    %29 = vector.extract_strided_slice %28 {offsets = [0, 0], sizes = [1, 128], strides = [1, 1]} : vector<4x128xf32> to vector<1x128xf32>
    %30 = vector.extract_strided_slice %28 {offsets = [1, 0], sizes = [1, 128], strides = [1, 1]} : vector<4x128xf32> to vector<1x128xf32>
    %31 = arith.addf %29, %30 : vector<1x128xf32>
    %32 = vector.extract_strided_slice %28 {offsets = [2, 0], sizes = [1, 128], strides = [1, 1]} : vector<4x128xf32> to vector<1x128xf32>
    %33 = vector.extract_strided_slice %28 {offsets = [3, 0], sizes = [1, 128], strides = [1, 1]} : vector<4x128xf32> to vector<1x128xf32>
    %34 = arith.addf %32, %33 : vector<1x128xf32>
    %35 = arith.addf %31, %34 : vector<1x128xf32>
    %36 = tpu.reciprocal %35 : vector<1x128xf32> -> vector<1x128xf32>
    %37 = vector.broadcast %36 : vector<1x128xf32> to vector<4x128xf32>
    %38 = arith.mulf %28, %37 : vector<4x128xf32>
    %c0_9 = arith.constant 0 : index
    %c0_10 = arith.constant 0 : index
    %39 = vector.load %arg3[%c0_9, %c0_10] : memref<4x128xf32, #tpu.memory_space<vmem>>, vector<4x128xf32>
    tpu.vector_store %arg3[%c0_9, %c0_10], %38 {strides = array<i32>} : memref<4x128xf32, #tpu.memory_space<vmem>>, vector<4x128xf32>,
    return
  }
  func.func @transform_0(%arg0: i32) -> (i32, i32) {
    %c0_i32 = arith.constant 0 : i32
    %c0_i32_0 = arith.constant 0 : i32
    %c0_i32_1 = arith.constant 0 : i32
    return %c0_i32, %c0_i32_0 : i32, i32
  }
  func.func @transform_1(%arg0: i32) -> (i32, i32) {
    %c0_i32 = arith.constant 0 : i32
    %c0_i32_0 = arith.constant 0 : i32
    return %c0_i32, %arg0 : i32, i32
  }
  func.func @transform_2(%arg0: i32) -> (i32, i32) {
    %c0_i32 = arith.constant 0 : i32
    %c0_i32_0 = arith.constant 0 : i32
    return %c0_i32, %arg0 : i32, i32
  }
}

</mosaic_0001>

<bundles_post_ra>
// kernel: my_policy_forward.1
= control target key start
LH: loop header
LB: loop body
LE: loop exit
PB: predicated region body
PF: predicated region fallthrough
CT: control target
= control target key end

     0   :  { %7 = vsyncpa [#allocation3], 0  ;;  %s563_s9 = smov [#allocation2]   ;;  %s634_s0 = inlined_call_operand.hbm [shape: f32[17,512], index: 0, kind: input, shape index: {}]   ;;  %s635_s1 = inlined_call_operand.vmem [shape: f32[8,128], index: 1, kind: input, shape index: {}]   ;;  %s636_s2 = inlined_call_operand.vmem [shape: f32[4,128], index: 2, kind: output, shape index: {}]  }
   0x1   :  { %s13_s10 = sshll.u32 %s563_s9, 4  ;;  %s14_s10 = int_to_ptr.vmem [resolvable:$true] %s13_s10 }
   0x2   :  { %s549_s11 = scalar_lea.vmem %s14_s10, 1536  ;;  %p554_p1 = scmp.lt.s32.totalorder %s14_s10, %s14_s10 }
   0x3   :  { %p550_p0 = scmp.ne.s32.totalorder %s14_s10, %s549_s11  ;;  %p555_p2 = scmp.lt.s32.totalorder %s549_s11, %s549_s11 }
   0x5   :  { %p556_p3 = por %p555_p2, %p554_p1 }
   0x7   :  { %p557_p4 = pnand %p556_p3, %p550_p0 }
   0x9   :  { %560 = shalt.err (!%p557_p4)
}
   0xa   :  { %s564_s12 = smov 512   ;;  %s565_s13 = smov 32  }
   0xb   :  { %19 = dma.hbm_to_vmem [thread:$0]  %s634_s0, 1536, %s14_s10, [#allocation3], %s564_s12, %s564_s12, %s565_s13  }
   0xc   :  { %561 = dma.done.wait [#allocation3], 1536  }
   0xd   :  { %562 = vsyncadd [#allocation3], 4294965760  ;;  %v566_v0 = vmov 0.0   ;;  %vm567_vm0 = vmmov 0   ;;  %v568_v1 = vmov 8   ;;  %vm51_vm1 = vcmask 64512  }
   0xe   :  { %477 = vmatprep.subr.mxu0 %v566_v0  ;;  %527 = vmatprep.subr.mxu1 %v566_v0  ;;  %v25_v2 = vld [vmem:[%s635_s1] sm:$0xff]  ;;  %vm151_vm2 = vcmask 1040384   ;;  %v27_v21 = vld [vmem:[#allocation2 + $0x8] sm:$0xff]  ;;  %vm141_vm3 = vcmask 138240   ;;  %v28_v33 = vld [vmem:[#allocation2 + $0x10] sm:$0xff]  ;;  %v417_v46 = vlaneseq }
   0xf   :  { %479 = vmatprep.mubr.msk.f32.mxu0 %vm567_vm0, %v566_v0  ;;  %485 = vmatprep.mubr.msk.f32.mxu1 %vm567_vm0, %v566_v0  ;;  %v26_v3 = vld [vmem:[#allocation2] sm:$0xff]  ;;  %v31_v22 = vld [vmem:[#allocation2 + $0x28] sm:$0xff]  ;;  %v32_v34 = vld [vmem:[#allocation2 + $0x30] sm:$0xff] }
  0x10   :  { %535 = vset.pattern.permute.xlu0 %v568_v1  ;;  %536 = vset.pattern.permute.xlu1 %v568_v1  ;;  %v33_v4 = vld [vmem:[#allocation2 + $0x40] sm:$0x1]  ;;  %v34_v23 = vld [vmem:[#allocation2 + $0x48] sm:$0x1]  ;;  %v35_v35 = vld [vmem:[#allocation2 + $0x50] sm:$0x1] }
  0x11   :  { %478 = vmatpush3.msra.mxu0 %v25_v2  ;;  %528 = vmatpush3.msra.mxu1 %v25_v2  ;;  %v30_v5 = vld [vmem:[#allocation2 + $0x20] sm:$0xff]  ;;  %v29_v45 = vld [vmem:[#allocation2 + $0x18] sm:$0xff]  ;;  %v418_v49 = vshrl.u32 %v417_v46, 7 }
  0x12   :  { %480 = vmatmul.mubr.msk.f32.vlgmr.msra.gmra.mxu0 %vm51_vm1, %v26_v3  ;;  %486 = vmatmul.mubr.msk.f32.vlgmr.msra.gmra.mxu1 %vm51_vm1, %v33_v4 }
  0x13   :  { %482 = vmatprep.mubr.msk.f32.mxu0 %vm567_vm0, %v566_v0  ;;  %48 = vperm.xlu0 %535, %v33_v4   ;;  %v419_v53 = vsub.s32 0, %v418_v49 }
  0x14   :  { %38 = vperm.xlu1 %536, %v26_v3   ;;  %488 = vmatprep.subr.mxu1 %v566_v0 }
  0x15   :  { %494 = vmatprep.mubr.msk.f32.mxu1 %vm567_vm0, %v566_v0  ;;  %503 = vmatprep.subr.mxu0 %v566_v0 }
  0x16   :  { %483 = vmatmul.mubr.msk.f32.gmra.mxu0 %vm51_vm1, %v30_v5 }
  0x17   :  { %43 = vperm.xlu0 %535, %v30_v5   ;;  %509 = vmatprep.mubr.msk.f32.mxu0 %vm567_vm0, %v566_v0 }
  0x8e   :  { %v49_v6 = vpop.permute.xlu0 %48 }
  0x8f   :  { %v39_v9 = vpop.permute.xlu1 %38 }
  0x92   :  { %v44_v14 = vpop.permute.xlu0 %43 }
  0xd2   :  { %v124_v7 = vpop.f32.mrf.mxu0  ;;  %v134_v8 = vpop.f32.mrf.mxu1 }
  0xd3   :  { %v135_v10 = vadd.f32 %v134_v8, %v49_v6  ;;  %v125_v16 = vadd.f32 %v124_v7, %v39_v9 }
  0xd4   :  { %v481_v11 = vpop.f32.mrf.mxu0  ;;  %v487_v12 = vpop.f32.mrf.mxu1 }
  0xd5   :  { %v140_v13 = vmax.f32 %v135_v10, 0.0  ;;  %v138_v20 = vmax.f32 %v125_v16, 0.0 }
  0xd6   :  { %v129_v15 = vpop.f32.mrf.mxu0 }
  0xd7   :  { %v130_v17 = vadd.f32 %v129_v15, %v44_v14  ;;  %489 = vmatpush3.msk.msra.mxu1 %vm151_vm2, %v140_v13 }
  0xd8   :  { %v484_v18 = vpop.f32.mrf.mxu0  ;;  %490 = vmatprep.subr.mxu1 %v566_v0 }
  0xd9   :  { %v139_v19 = vmax.f32 %v130_v17, 0.0 }
  0xdb   :  { %491 = vmatpush3.msra.mxu1 %v139_v19 }
  0xdc   :  { %492 = vmatprep.subr.mxu1 %v566_v0 }
  0xdd   :  { %493 = vmatpush3.msra.mxu1 %v138_v20 }
  0xde   :  { %495 = vmatmul.mubr.msk.f32.vlgmr.msra.gmra.mxu1 %vm141_vm3, %v27_v21  ;;  %518 = vmatprep.subr.mxu1 %v566_v0 }
  0xdf   :  { %497 = vmatprep.mubr.msk.f32.mxu1 %vm567_vm0, %v566_v0 }
  0xe2   :  { %498 = vmatmul.mubr.msk.f32.gmra.mxu1 %vm141_vm3, %v31_v22 }
  0xe3   :  { %500 = vmatprep.mubr.msk.f32.mxu1 %vm567_vm0, %v566_v0 }
  0xe6   :  { %501 = vmatmul.mubr.msk.f32.gmra.mxu1 %vm141_vm3, %v34_v23 }
  0xe7   :  { %524 = vmatprep.mubr.msk.f32.mxu1 %vm567_vm0, %v566_v0 }
 0x19e   :  { %v221_v24 = vpop.f32.mrf.mxu1 }
 0x19f   :  { %v235_v32 = vmax.f32 %v221_v24, 0.0 }
 0x1a0   :  { %v496_v25 = vpop.f32.mrf.mxu1 }
 0x1a2   :  { %v226_v26 = vpop.f32.mrf.mxu1 }
 0x1a3   :  { %v236_v31 = vmax.f32 %v226_v26, 0.0 }
 0x1a4   :  { %v499_v27 = vpop.f32.mrf.mxu1 }
 0x1a6   :  { %v231_v28 = vpop.f32.mrf.mxu1 }
 0x1a7   :  { %v237_v29 = vmax.f32 %v231_v28, 0.0 }
 0x1a8   :  { %v502_v30 = vpop.f32.mrf.mxu1 }
 0x1a9   :  { %504 = vmatpush3.msk.msra.mxu0 %vm151_vm2, %v237_v29 }
 0x1aa   :  { %505 = vmatprep.subr.mxu0 %v566_v0 }
 0x1ab   :  { %506 = vmatpush3.msra.mxu0 %v236_v31 }
 0x1ac   :  { %507 = vmatprep.subr.mxu0 %v566_v0 }
 0x1ad   :  { %508 = vmatpush3.msra.mxu0 %v235_v32 }
 0x1ae   :  { %510 = vmatmul.mubr.msk.f32.vlgmr.msra.gmra.mxu0 %vm141_vm3, %v28_v33 }
 0x1af   :  { %512 = vmatprep.mubr.msk.f32.mxu0 %vm567_vm0, %v566_v0 }
 0x1b2   :  { %513 = vmatmul.mubr.msk.f32.gmra.mxu0 %vm141_vm3, %v32_v34 }
 0x1b3   :  { %515 = vmatprep.mubr.msk.f32.mxu0 %vm567_vm0, %v566_v0 }
 0x1b6   :  { %516 = vmatmul.mubr.msk.f32.gmra.mxu0 %vm141_vm3, %v35_v35 }
 0x26e   :  { %v316_v36 = vpop.f32.mrf.mxu0 }
 0x26f   :  { %v330_v44 = vmax.f32 %v316_v36, 0.0 }
 0x270   :  { %v511_v37 = vpop.f32.mrf.mxu0 }
 0x272   :  { %v321_v38 = vpop.f32.mrf.mxu0 }
 0x273   :  { %v331_v43 = vmax.f32 %v321_v38, 0.0 }
 0x274   :  { %v514_v39 = vpop.f32.mrf.mxu0 }
 0x276   :  { %v326_v40 = vpop.f32.mrf.mxu0 }
 0x277   :  { %v332_v41 = vmax.f32 %v326_v40, 0.0 }
 0x278   :  { %v517_v42 = vpop.f32.mrf.mxu0 }
 0x279   :  { %519 = vmatpush3.msk.msra.mxu1 %vm151_vm2, %v332_v41 }
 0x27a   :  { %520 = vmatprep.subr.mxu1 %v566_v0 }
 0x27b   :  { %521 = vmatpush3.msra.mxu1 %v331_v43 }
 0x27c   :  { %522 = vmatprep.subr.mxu1 %v566_v0 }
 0x27d   :  { %523 = vmatpush3.msra.mxu1 %v330_v44 }
 0x27e   :  { %525 = vmatmul.mubr.msk.f32.vlgmr.msra.gmra.mxu1 %vm141_vm3, %v29_v45 }
 0x33e   :  { %v405_v47 = vpop.f32.mrf.mxu1 }
 0x33f   :  { %v410_v48 = vrot.slane %v405_v47, 1 }
 0x340   :  { %v526_v50 = vpop.f32.mrf.mxu1 }
 0x341   :  { %v412_v51 = vmax.f32 %v405_v47, %v410_v48 }
 0x343   :  { %v414_v52 = vrot.slane %v412_v51, 2 }
 0x345   :  { %v416_v54 = vmax.f32 %v412_v51, %v414_v52 }
 0x347   :  { %v420_v55 = vrot.slane %v416_v54, %v419_v53 }
 0x349   :  { %v421_v56 = vsub.f32 %v405_v47, %v420_v55 }
 0x34b   :  { %v422_v57 = vmul.f32 1.442695, %v421_v56 }
 0x34d   :  { %537 = vpow2.f32 %v422_v57 }
 0x35a   :  { %v538_v58 = vpop.eup %537 }
 0x35b   :  { %v425_v59 = vrot.slane %v538_v58, 1 }
 0x35d   :  { %v427_v60 = vadd.f32 %v538_v58, %v425_v59 }
 0x35f   :  { %v429_v61 = vrot.slane %v427_v60, 2 }
 0x361   :  { %v431_v62 = vadd.f32 %v429_v61, %v427_v60 }
 0x363   :  { %539 = vrcp.f32 %v431_v62 }
 0x370   :  { %v540_v63 = vpop.eup %539 }
 0x371   :  { %v436_v0 = vrot.slane %v540_v63, %v419_v53 }
 0x373   :  { %v437_v1 = vmul.f32 %v538_v58, %v436_v0 }
 0x375   :  { %438 = vst [vmem:[%s636_s2] sm:$0xf] %v437_v1 }
 0x376   :  { %443 = vsyncpa [#allocation3], 1 }

</bundles_post_ra>
